<compile_context>
chip_gen: v7x
topology: tpu7x:2x2x1
jax: 0.10.0
libtpu: 0.0.40
codegen_flags: <defaults>
</compile_context>

<pallas_src>
import functools

import jax
import jax.numpy as jnp
from jax.experimental import pallas as pl
from jax.experimental.pallas import tpu as pltpu


def _wce_kernel(pred_ref, tgt_ref, nllsum_ref, counts_ref, *, hw, tile_hw, g_inner):
    """Accumulate per-class NLL sums and per-class counts across spatial tiles.

    pred_ref   : (bn, C, T)  logits block (native dtype); class on sublanes, space on lanes
    tgt_ref    : (bn, 1, T)  int8/int32 labels
    nllsum_ref : (bn, C, 1)  f32 accumulator, resident across the reduction (last) grid axis
    counts_ref : (bn, C, 1)  i32 accumulator (exact counts)
    """
    @pl.when(pl.program_id(2) == 0)
    def _():
        nllsum_ref[...] = jnp.zeros_like(nllsum_ref)
        counts_ref[...] = jnp.zeros_like(counts_ref)

    logits = pred_ref[...].astype(jnp.float32)                     # (bn, C, T)
    t = tgt_ref[...].astype(jnp.int32)                             # (bn, 1, T)

    # Validity mask for the ragged spatial tail and for clamped "virtual" blocks:
    # column position in the UNCLAMPED flattened H*W axis.
    col_start = (pl.program_id(1) * g_inner + pl.program_id(2)) * tile_hw
    col = col_start + jax.lax.broadcasted_iota(jnp.int32, (1, 1, tile_hw), 2)
    valid = col < hw                                               # (1, 1, T)

    classes = jax.lax.broadcasted_iota(jnp.int32, logits.shape, 1)
    match = (t == classes) & valid                                 # (bn, C, T) bool

    # log-softmax over the class (sublane) axis; shifted <= 0 keeps garbage tail columns finite,
    # and any NaN there is killed by the where() below.
    m = jnp.max(logits, axis=1, keepdims=True)                     # (bn, 1, T)
    shifted = logits - m
    lse = jnp.log(jnp.sum(jnp.exp(shifted), axis=1, keepdims=True))  # (bn, 1, T)

    # per-pixel NLL = lse - shifted[target]; route it to its class row and lane-reduce.
    contrib = jnp.where(match, lse - shifted, 0.0)                 # (bn, C, T)
    nllsum_ref[...] += jnp.sum(contrib, axis=2, keepdims=True)             # (bn, C, 1) f32
    counts_ref[...] += jnp.sum(match.astype(jnp.int32), axis=2, keepdims=True)  # (bn, C, 1) i32


def weighted_cross_entropy_loss(predict, target, num_classes=None, *,
                                block_bytes=4 << 20, num_spatial_chunks=2):
    """Matches WeightedCrossEntropyLoss.forward(predict, target).

    predict: (N, C, H, W) float (any float dtype; cast to f32 inside the kernel)
    target : (N, 1, H, W) or (N, H, W) integer class labels in [0, C)

    block_bytes        : budget for the f32 working block per grid step (per-chip tuning knob:
                         ~1-2 MiB v5e, 2-4 MiB v6e, 4-8 MiB v7x).
    num_spatial_chunks : outer "parallel" split of the spatial axis (2 keeps both v7x
                         TensorCores busy even at batch size 1; neutral on v5e/v6e).
    """
    N, C = predict.shape[0], predict.shape[1]
    if num_classes is not None:
        assert C == num_classes

    if target.ndim == predict.ndim:
        assert target.shape[1] == 1
        target = target[:, 0]

    HW = 1
    for d in predict.shape[2:]:
        HW *= d

    pred3 = predict.reshape(N, C, HW)                      # free reshape (NCHW contiguous)
    # Labels as int8 when they fit: 4x less target HBM traffic on mem-bound chips.
    tgt_dtype = jnp.int8 if C <= 127 else jnp.int32
    tgt3 = target.reshape(N, 1, HW).astype(tgt_dtype)

    itemsize = jnp.dtype(pred3.dtype).itemsize
    row_f32 = C * 4                                        # f32 working bytes per spatial column
    if row_f32 * HW <= block_bytes:
        # Small images: take the full spatial extent and pack several batch rows per step
        # (bn must divide N so no batch masking is needed).
        tile_hw = HW
        max_bn = max(1, block_bytes // (row_f32 * HW))
        bn = 1
        for cand in range(min(N, max_bn), 0, -1):
            if N % cand == 0:
                bn = cand
                break
    else:
        tile_hw = max(128, (block_bytes // row_f32) // 128 * 128)
        bn = 1

    g_total = pl.cdiv(HW, tile_hw)                 # real spatial blocks (last one may be ragged)
    p_chunks = max(1, min(num_spatial_chunks, g_total))
    g_inner = pl.cdiv(g_total, p_chunks)           # reduction steps per chunk
    nb = N // bn

    # Index maps clamp "virtual" blocks of the last chunk to the last real block; their
    # contribution is zeroed in-kernel by the unclamped column mask (no OOB DMA is issued).
    def spatial_blk(p, g):
        return jnp.minimum(p * g_inner + g, g_total - 1)

    pred_spec = pl.BlockSpec((bn, C, tile_hw), lambda n, p, g: (n, 0, spatial_blk(p, g)))
    tgt_spec = pl.BlockSpec((bn, 1, tile_hw), lambda n, p, g: (n, 0, spatial_blk(p, g)))
    # Per-(chunk, batch) accumulators; leading chunk dim squeezed from the kernel view.
    acc_spec = pl.BlockSpec((None, bn, C, 1), lambda n, p, g: (p, n, 0, 0))

    # Explicit VMEM budget: 2x double-buffered inputs + ~6 f32-block temporaries + slack.
    pred_block = bn * C * tile_hw * itemsize
    tgt_block = bn * tile_hw * jnp.dtype(tgt_dtype).itemsize
    f32_block = bn * C * tile_hw * 4
    vmem_limit = int(min(max(2 * (pred_block + tgt_block) + 6 * f32_block + (4 << 20),
                             16 << 20), 64 << 20))

    kernel = functools.partial(_wce_kernel, hw=HW, tile_hw=tile_hw, g_inner=g_inner)
    nll_sums, counts = pl.pallas_call(
        kernel,
        out_shape=(jax.ShapeDtypeStruct((p_chunks, N, C, 1), jnp.float32),
                   jax.ShapeDtypeStruct((p_chunks, N, C, 1), jnp.int32)),
        grid=(nb, p_chunks, g_inner),
        in_specs=[pred_spec, tgt_spec],
        out_specs=(acc_spec, acc_spec),
        compiler_params=pltpu.CompilerParams(
            dimension_semantics=("parallel", "parallel", "arbitrary"),
            vmem_limit_bytes=vmem_limit),
    )(pred3, tgt3)

    # Tiny XLA epilogue on (C,)-sized arrays: weights + weighted mean.
    nll_c = jnp.sum(nll_sums[..., 0], axis=(0, 1))                        # (C,)
    counts_c = jnp.sum(counts[..., 0], axis=(0, 1)).astype(jnp.float32)   # (C,), exact
    weight = 1.0 - counts_c / jnp.sum(counts_c)
    num = jnp.sum(weight * nll_c)                  # = sum_i w[y_i] * nll_i
    den = jnp.sum(weight * counts_c)               # = sum_i w[y_i]
    return num / den                               # NaN if one class covers every pixel
                                                   # (same as the torch reference)


if __name__ == "__main__":
    def _reference(predict, target):
        # Pure-JAX mirror of torch: weight_c = count_c, w = 1 - count/total,
        # F.cross_entropy(predict, target, w) with weighted-mean reduction.
        N, C = predict.shape[0], predict.shape[1]
        t = target[:, 0].reshape(-1) if target.ndim == predict.ndim else target.reshape(-1)
        p = jnp.moveaxis(predict, 1, -1).reshape(-1, C).astype(jnp.float32)
        counts = jnp.sum(t[:, None] == jnp.arange(C)[None, :], axis=0).astype(jnp.float32)
        w = 1.0 - counts / jnp.sum(counts)
        logp = jax.nn.log_softmax(p, axis=-1)
        nll = -jnp.take_along_axis(logp, t[:, None], axis=-1)[:, 0]
        return jnp.sum(w[t] * nll) / jnp.sum(w[t])

    key = jax.random.PRNGKey(0)
    k1, k2, k3, k4 = jax.random.split(key, 4)

    # Case 1: canonical small NCHW input (single block, bn=2 batch packing).
    N, C, H, W = 2, 4, 16, 16
    predict = jax.random.normal(k1, (N, C, H, W), dtype=jnp.float32)
    target = jax.random.randint(k2, (N, 1, H, W), 0, C, dtype=jnp.int32)
    loss = jax.block_until_ready(weighted_cross_entropy_loss(predict, target, C))
    ref = _reference(predict, target)
    assert jnp.allclose(loss, ref, rtol=1e-5, atol=1e-5), (loss, ref)

    # Case 2: ragged H*W with a tiny forced block size -> exercises the in-kernel tail mask,
    # multi-block reduction and the 2-chunk "parallel" spatial split (no HBM padding copy).
    N2, C2, H2, W2 = 1, 3, 15, 17
    predict2 = jax.random.normal(k3, (N2, C2, H2, W2), dtype=jnp.float32)
    target2 = jax.random.randint(k4, (N2, 1, H2, W2), 0, C2, dtype=jnp.int32)
    loss2 = jax.block_until_ready(
        weighted_cross_entropy_loss(predict2, target2, C2, block_bytes=C2 * 4 * 128))
    ref2 = _reference(predict2, target2)
    assert jnp.allclose(loss2, ref2, rtol=1e-5, atol=1e-5), (loss2, ref2)

    print("KERNEL_OK")
</pallas_src>

<mosaic_0001>
module attributes {stable_mosaic.version = 11 : i64} {
  func.func @_wce_kernel(%arg0: i32, %arg1: i32, %arg2: i32, %arg3: memref<2x4x256xf32, #tpu.memory_space<vmem>>, %arg4: memref<2x1x256xi8, #tpu.memory_space<vmem>>, %arg5: memref<1x2x4x1xf32, #tpu.memory_space<vmem>>, %arg6: memref<1x2x4x1xi32, #tpu.memory_space<vmem>>) attributes {dimension_semantics = [#tpu.dimension_semantics<parallel>, #tpu.dimension_semantics<parallel>, #tpu.dimension_semantics<arbitrary>], iteration_bounds = array<i64: 1, 1, 1>, scalar_prefetch = 0 : i64, scratch_operands = 0 : i64, tpu.core_type = #tpu.core_type<tc>, window_params = [{transform_indices = @transform_0, window_bounds = array<i64: 2, 4, 256>}, {transform_indices = @transform_1, window_bounds = array<i64: 2, 1, 256>}, {transform_indices = @transform_2, window_bounds = array<i64: 1, 2, 4, 1>}, {transform_indices = @transform_3, window_bounds = array<i64: 1, 2, 4, 1>}]} {
    %c0_i32 = arith.constant 0 : i32
    %0 = arith.cmpi eq, %arg2, %c0_i32 : i32
    %1 = arith.extui %0 : i1 to i32
    %c0_i32_0 = arith.constant 0 : i32
    %2 = arith.cmpi ne, %1, %c0_i32_0 : i32
    scf.if %2 {
      %cst_27 = arith.constant 0.000000e+00 : f32
      %48 = vector.broadcast %cst_27 : f32 to vector<2x4x1xf32>
      %c0_28 = arith.constant 0 : index
      %c0_29 = arith.constant 0 : index
      %c0_30 = arith.constant 0 : index
      %c0_31 = arith.constant 0 : index
      %49 = vector.load %arg5[%c0_28, %c0_29, %c0_30, %c0_31] : memref<1x2x4x1xf32, #tpu.memory_space<vmem>>, vector<1x2x4x1xf32>
      %50 = vector.shape_cast %49 : vector<1x2x4x1xf32> to vector<2x4x1xf32>
      %51 = vector.shape_cast %48 : vector<2x4x1xf32> to vector<1x2x4x1xf32>
      tpu.vector_store %arg5[%c0_28, %c0_29, %c0_30, %c0_31], %51 {strides = array<i32>} : memref<1x2x4x1xf32, #tpu.memory_space<vmem>>, vector<1x2x4x1xf32>,
      %c0_i32_32 = arith.constant 0 : i32
      %52 = vector.broadcast %c0_i32_32 : i32 to vector<2x4x1xi32>
      %c0_33 = arith.constant 0 : index
      %c0_34 = arith.constant 0 : index
      %c0_35 = arith.constant 0 : index
      %c0_36 = arith.constant 0 : index
      %53 = vector.load %arg6[%c0_33, %c0_34, %c0_35, %c0_36] : memref<1x2x4x1xi32, #tpu.memory_space<vmem>>, vector<1x2x4x1xi32>
      %54 = vector.shape_cast %53 : vector<1x2x4x1xi32> to vector<2x4x1xi32>
      %55 = vector.shape_cast %52 : vector<2x4x1xi32> to vector<1x2x4x1xi32>
      tpu.vector_store %arg6[%c0_33, %c0_34, %c0_35, %c0_36], %55 {strides = array<i32>} : memref<1x2x4x1xi32, #tpu.memory_space<vmem>>, vector<1x2x4x1xi32>,
    } else {
    }
    %c0 = arith.constant 0 : index
    %c0_1 = arith.constant 0 : index
    %c0_2 = arith.constant 0 : index
    %3 = vector.load %arg3[%c0, %c0_1, %c0_2] : memref<2x4x256xf32, #tpu.memory_space<vmem>>, vector<2x4x256xf32>
    %c0_3 = arith.constant 0 : index
    %c0_4 = arith.constant 0 : index
    %c0_5 = arith.constant 0 : index
    %4 = vector.load %arg4[%c0_3, %c0_4, %c0_5] : memref<2x1x256xi8, #tpu.memory_space<vmem>>, vector<2x1x256xi8>
    %5 = arith.extsi %4 : vector<2x1x256xi8> to vector<2x1x256xi32>
    %c1_i32 = arith.constant 1 : i32
    %6 = arith.muli %arg1, %c1_i32 : i32
    %7 = arith.addi %6, %arg2 : i32
    %c256_i32 = arith.constant 256 : i32
    %8 = arith.muli %7, %c256_i32 : i32
    %9 = tpu.iota {dimensions = array<i32: 2>} : vector<1x1x256xi32>
    %10 = vector.broadcast %8 : i32 to vector<1x1x256xi32>
    %11 = arith.addi %10, %9 : vector<1x1x256xi32>
    %c256_i32_6 = arith.constant 256 : i32
    %12 = vector.broadcast %c256_i32_6 : i32 to vector<1x1x256xi32>
    %13 = arith.cmpi slt, %11, %12 : vector<1x1x256xi32>
    %14 = tpu.iota {dimensions = array<i32: 1>} : vector<2x4x256xi32>
    %15 = vector.broadcast %5 : vector<2x1x256xi32> to vector<2x4x256xi32>
    %16 = arith.cmpi eq, %15, %14 : vector<2x4x256xi32>
    %17 = vector.broadcast %13 : vector<1x1x256xi1> to vector<2x4x256xi1>
    %18 = arith.andi %16, %17 : vector<2x4x256xi1>
    %cst = arith.constant dense<0xFF800000> : vector<2x256xf32>
    %19 = vector.multi_reduction <maximumf>, %3, %cst [1] : vector<2x4x256xf32> to vector<2x256xf32>
    %20 = vector.shape_cast %19 : vector<2x256xf32> to vector<2x1x256xf32>
    %21 = vector.broadcast %20 : vector<2x1x256xf32> to vector<2x4x256xf32>
    %22 = arith.subf %3, %21 : vector<2x4x256xf32>
    %23 = math.exp %22 : vector<2x4x256xf32>
    %cst_7 = arith.constant dense<0.000000e+00> : vector<2x256xf32>
    %24 = vector.multi_reduction <add>, %23, %cst_7 [1] : vector<2x4x256xf32> to vector<2x256xf32>
    %25 = vector.shape_cast %24 : vector<2x256xf32> to vector<2x1x256xf32>
    %26 = math.log %25 : vector<2x1x256xf32>
    %27 = vector.broadcast %26 : vector<2x1x256xf32> to vector<2x4x256xf32>
    %28 = arith.subf %27, %22 : vector<2x4x256xf32>
    %cst_8 = arith.constant 0.000000e+00 : f32
    %29 = vector.broadcast %cst_8 : f32 to vector<2x4x256xf32>
    %30 = arith.select %18, %28, %29 : vector<2x4x256xi1>, vector<2x4x256xf32>
    %c0_9 = arith.constant 0 : index
    %c0_10 = arith.constant 0 : index
    %c0_11 = arith.constant 0 : index
    %c0_12 = arith.constant 0 : index
    %31 = vector.load %arg5[%c0_9, %c0_10, %c0_11, %c0_12] : memref<1x2x4x1xf32, #tpu.memory_space<vmem>>, vector<1x2x4x1xf32>
    %32 = vector.shape_cast %31 : vector<1x2x4x1xf32> to vector<2x4x1xf32>
    %cst_13 = arith.constant dense<0.000000e+00> : vector<2x4xf32>
    %33 = vector.multi_reduction <add>, %30, %cst_13 [2] : vector<2x4x256xf32> to vector<2x4xf32>
    %34 = vector.shape_cast %33 : vector<2x4xf32> to vector<2x4x1xf32>
    %35 = arith.addf %32, %34 : vector<2x4x1xf32>
    %c0_14 = arith.constant 0 : index
    %c0_15 = arith.constant 0 : index
    %c0_16 = arith.constant 0 : index
    %c0_17 = arith.constant 0 : index
    %36 = vector.load %arg5[%c0_14, %c0_15, %c0_16, %c0_17] : memref<1x2x4x1xf32, #tpu.memory_space<vmem>>, vector<1x2x4x1xf32>
    %37 = vector.shape_cast %36 : vector<1x2x4x1xf32> to vector<2x4x1xf32>
    %38 = vector.shape_cast %35 : vector<2x4x1xf32> to vector<1x2x4x1xf32>
    tpu.vector_store %arg5[%c0_14, %c0_15, %c0_16, %c0_17], %38 {strides = array<i32>} : memref<1x2x4x1xf32, #tpu.memory_space<vmem>>, vector<1x2x4x1xf32>,
    %c0_18 = arith.constant 0 : index
    %c0_19 = arith.constant 0 : index
    %c0_20 = arith.constant 0 : index
    %c0_21 = arith.constant 0 : index
    %39 = vector.load %arg6[%c0_18, %c0_19, %c0_20, %c0_21] : memref<1x2x4x1xi32, #tpu.memory_space<vmem>>, vector<1x2x4x1xi32>
    %40 = vector.shape_cast %39 : vector<1x2x4x1xi32> to vector<2x4x1xi32>
    %41 = arith.extui %18 : vector<2x4x256xi1> to vector<2x4x256xi32>
    %cst_22 = arith.constant dense<0> : vector<2x4xi32>
    %42 = vector.multi_reduction <add>, %41, %cst_22 [2] : vector<2x4x256xi32> to vector<2x4xi32>
    %43 = vector.shape_cast %42 : vector<2x4xi32> to vector<2x4x1xi32>
    %44 = arith.addi %40, %43 : vector<2x4x1xi32>
    %c0_23 = arith.constant 0 : index
    %c0_24 = arith.constant 0 : index
    %c0_25 = arith.constant 0 : index
    %c0_26 = arith.constant 0 : index
    %45 = vector.load %arg6[%c0_23, %c0_24, %c0_25, %c0_26] : memref<1x2x4x1xi32, #tpu.memory_space<vmem>>, vector<1x2x4x1xi32>
    %46 = vector.shape_cast %45 : vector<1x2x4x1xi32> to vector<2x4x1xi32>
    %47 = vector.shape_cast %44 : vector<2x4x1xi32> to vector<1x2x4x1xi32>
    tpu.vector_store %arg6[%c0_23, %c0_24, %c0_25, %c0_26], %47 {strides = array<i32>} : memref<1x2x4x1xi32, #tpu.memory_space<vmem>>, vector<1x2x4x1xi32>,
    return
  }
  func.func @transform_0(%arg0: i32, %arg1: i32, %arg2: i32) -> (i32, i32, i32) {
    %c1_i32 = arith.constant 1 : i32
    %0 = arith.muli %arg1, %c1_i32 : i32
    %1 = arith.addi %0, %arg2 : i32
    %c0_i32 = arith.constant 0 : i32
    %2 = arith.minsi %1, %c0_i32 : i32
    %c0_i32_0 = arith.constant 0 : i32
    %c0_i32_1 = arith.constant 0 : i32
    return %arg0, %c0_i32_0, %2 : i32, i32, i32
  }
  func.func @transform_1(%arg0: i32, %arg1: i32, %arg2: i32) -> (i32, i32, i32) {
    %c1_i32 = arith.constant 1 : i32
    %0 = arith.muli %arg1, %c1_i32 : i32
    %1 = arith.addi %0, %arg2 : i32
    %c0_i32 = arith.constant 0 : i32
    %2 = arith.minsi %1, %c0_i32 : i32
    %c0_i32_0 = arith.constant 0 : i32
    %c0_i32_1 = arith.constant 0 : i32
    return %arg0, %c0_i32_0, %2 : i32, i32, i32
  }
  func.func @transform_2(%arg0: i32, %arg1: i32, %arg2: i32) -> (i32, i32, i32, i32) {
    %c0_i32 = arith.constant 0 : i32
    %c0_i32_0 = arith.constant 0 : i32
    %c0_i32_1 = arith.constant 0 : i32
    return %arg1, %arg0, %c0_i32, %c0_i32_0 : i32, i32, i32, i32
  }
  func.func @transform_3(%arg0: i32, %arg1: i32, %arg2: i32) -> (i32, i32, i32, i32) {
    %c0_i32 = arith.constant 0 : i32
    %c0_i32_0 = arith.constant 0 : i32
    %c0_i32_1 = arith.constant 0 : i32
    return %arg1, %arg0, %c0_i32, %c0_i32_0 : i32, i32, i32, i32
  }
}

</mosaic_0001>

<bundles_post_ra>
// kernel: tpu_custom_call.1
= control target key start
LH: loop header
LB: loop body
LE: loop exit
PB: predicated region body
PF: predicated region fallthrough
CT: control target
= control target key end

     0   :  { %9 = vsyncpa [#allocation3], 0  ;;  %s360_s12 = smov [#allocation2]   ;;  %s510_s0 = inlined_call_operand.hbm [shape: f32[2,4,256], index: 0, kind: input, shape index: {}]   ;;  %s511_s1 = inlined_call_operand.vmem [shape: s8[2,1,256], index: 1, kind: input, shape index: {}]   ;;  %s512_s2 = inlined_call_operand.vmem [shape: f32[1,2,4,1], index: 2, kind: output, shape index: {0}]   ;;  %s513_s3 = inlined_call_operand.vmem [shape: s32[1,2,4,1], index: 3, kind: output, shape index: {1}]  }
   0x1   :  { %s21_s13 = sshll.u32 %s360_s12, 4  ;;  %s336_s16 = scalar_lea.hbm %s510_s0, 256  ;;  %s22_s13 = int_to_ptr.vmem [resolvable:$true] %s21_s13 }
   0x2   :  { %p337_p0 = scmp.ne.s32.totalorder %s510_s0, %s336_s16  ;;  %p340_p1 = scmp.lt.u32.totalorder %s336_s16, %s510_s0 }
   0x4   :  { %p342_p2 = pnand %p340_p1, %p337_p0 }
   0x6   :  { %345 = shalt.err (!%p342_p2)
}
   0x7   :  { %s346_s21 = scalar_lea.vmem %s22_s13, 256  ;;  %p351_p4 = scmp.lt.s32.totalorder %s22_s13, %s22_s13 }
   0x8   :  { %p347_p3 = scmp.ne.s32.totalorder %s22_s13, %s346_s21  ;;  %p352_p5 = scmp.lt.s32.totalorder %s346_s21, %s346_s21 }
   0xa   :  { %p353_p6 = por %p352_p5, %p351_p4 }
   0xc   :  { %p354_p7 = pnand %p353_p6, %p347_p3 }
   0xe   :  { %357 = shalt.err (!%p354_p7)
}
   0xf   :  { %s361_s22 = smov 128   ;;  %s362_s23 = smov 8  }
  0x10   :  { %27 = dma.hbm_to_vmem [thread:$0]  %s510_s0, 256, %s22_s13, [#allocation3], %s361_s22, %s361_s22, %s362_s23  }
  0x11   :  { %358 = dma.done.wait [#allocation3], 256  }
  0x12   :  { %359 = vsyncadd [#allocation3], 4294967040  ;;  %v91_v0 = vlaneseq  ;;  %vm143_vm0 = vcmask 1043456   ;;  %v314_v4 = vld [vmem:[%s511_s1] sm:$0xf]   ;;  %v400_v5 = vld [vmem:[#allocation2 + $0x8] sm:$0xff] }
  0x13   :  { %v402_v6 = vld [vmem:[#allocation2] sm:$0xff]  ;;  %v315_v7 = vunpack.c.0.s8 %v314_v4  ;;  %v316_v8 = vunpack.c.1.s8 %v314_v4  ;;  %v140_v9 = vcombine.high %v400_v5, %v400_v5  ;;  %v158_v10 = vsel %vm143_vm0, %v400_v5, -inf }
  0x14   :  { %v92_v1 = vshrl.u32 %v91_v0, 7  ;;  %v159_v11 = vrot.slane %v158_v10, 4  ;;  %v139_v12 = vcombine.high %v402_v6, %v402_v6  ;;  %v144_v13 = vsel %vm143_vm0, %v402_v6, -inf }
  0x15   :  { %v165_v19 = vsel %vm143_vm0, %v140_v9, -inf  ;;  %v145_v20 = vrot.slane %v144_v13, 4  ;;  %v363_v34 = vmov 0   ;;  %vm70_vm5 = vcmask 3072  }
  0x16   :  { %v95_v2 = vsub.s32 0, %v92_v1  ;;  %v99_v3 = vsub.s32 4, %v92_v1  ;;  %v160_v18 = vmax.f32 %v158_v10, %v159_v11  ;;  %v151_v21 = vsel %vm143_vm0, %v139_v12, -inf  ;;  %73 = vst.msk [vmem:[%s513_s3] sm:$0xf] %vm70_vm5, %v363_v34 }
  0x17   :  { %v166_v27 = vrot.slane %v165_v19, 4  ;;  %v146_v28 = vmax.f32 %v144_v13, %v145_v20  ;;  %v152_v29 = vrot.slane %v151_v21, 4  ;;  %74 = vst.msk [vmem:[%s513_s3 + $0x4] sm:$0xf] %vm70_vm5, %v363_v34 }
  0x18   :  { %v96_v14 = vrot.slane %v315_v7, %v95_v2  ;;  %v100_v15 = vrot.slane %v315_v7, %v99_v3  ;;  %v104_v16 = vrot.slane %v316_v8, %v95_v2  ;;  %v108_v17 = vrot.slane %v316_v8, %v99_v3 }
  0x19   :  { %v161_v26 = vrot.slane %v160_v18, 2  ;;  %v167_v46 = vmax.f32 %v165_v19, %v166_v27  ;;  %v147_v47 = vrot.slane %v146_v28, 2  ;;  %v153_v48 = vmax.f32 %v151_v21, %v152_v29 }
  0x1a   :  { %v112_v22 = vrot.slane %v96_v14, %v95_v2  ;;  %v116_v23 = vrot.slane %v100_v15, %v95_v2  ;;  %v120_v24 = vrot.slane %v104_v16, %v95_v2  ;;  %v124_v25 = vrot.slane %v108_v17, %v95_v2 }
  0x1b   :  { %v162_v45 = vmax.f32 %v160_v18, %v161_v26  ;;  %v168_v54 = vrot.slane %v167_v46, 2  ;;  %v148_v55 = vmax.f32 %v146_v28, %v147_v47  ;;  %v154_v56 = vrot.slane %v153_v48, 2 }
  0x1c   :  { %vm414_vm1 = vcmp.eq.s32.totalorder %v112_v22, %v92_v1  ;;  %vm418_vm2 = vcmp.eq.s32.totalorder %v116_v23, %v92_v1  ;;  %vm422_vm3 = vcmp.eq.s32.totalorder %v120_v24, %v92_v1  ;;  %vm426_vm4 = vcmp.eq.s32.totalorder %v124_v25, %v92_v1 }
  0x1d   :  { %v261_v35 = vsel %vm414_vm1, 1, %v363_v34  ;;  %v262_v36 = vsel %vm418_vm2, 1, %v363_v34  ;;  %v263_v37 = vsel %vm422_vm3, 1, %v363_v34  ;;  %v264_v38 = vsel %vm426_vm4, 1, %v363_v34  ;;  %v259_v33 = vld [vmem:[%s513_s3] sm:$0xf] }
  0x1e   :  { %v265_v39 = vsel %vm143_vm0, %v261_v35, 0  ;;  %v266_v40 = vsel %vm143_vm0, %v262_v36, 0  ;;  %v280_v41 = vsel %vm143_vm0, %v263_v37, 0  ;;  %v281_v42 = vsel %vm143_vm0, %v264_v38, 0 }
  0x1f   :  { %v267_v43 = vadd.s32 %v266_v40, %v265_v39  ;;  %v282_v44 = vadd.s32 %v281_v42, %v280_v41  ;;  %v163_v53 = vrot.slane %v162_v45, 1  ;;  %v169_v59 = vmax.f32 %v167_v46, %v168_v54 }
  0x20   :  { %v149_v60 = vrot.slane %v148_v55, 1  ;;  %v155_v61 = vmax.f32 %v153_v48, %v154_v56  ;;  %v364_v28 = vmov 0.0  }
  0x21   :  { %v269_v49 = vshrl.u32 %v267_v43, 16  ;;  %v268_v50 = vand.u32 65535, %v267_v43  ;;  %v284_v51 = vshrl.u32 %v282_v44, 16  ;;  %v283_v52 = vand.u32 65535, %v282_v44  ;;  %72 = vst.msk [vmem:[%s512_s2 + $0x4] sm:$0xf] %vm70_vm5, %v364_v28 }
  0x22   :  { %v164_v0 = vmax.f32 %v162_v45, %v163_v53  ;;  %v170_v1 = vrot.slane %v169_v59, 1  ;;  %v150_v2 = vmax.f32 %v148_v55, %v149_v60  ;;  %v156_v3 = vrot.slane %v155_v61, 1  ;;  %71 = vst.msk [vmem:[%s512_s2] sm:$0xf] %vm70_vm5, %v364_v28 }
  0x23   :  { %v271_v57 = vcvt.s32.f32 %v269_v49  ;;  %v270_v58 = vcvt.s32.f32 %v268_v50  ;;  %v286_v62 = vcvt.s32.f32 %v284_v51  ;;  %v285_v63 = vcvt.s32.f32 %v283_v52 }
  0x24   :  { %v171_v4 = vmax.f32 %v169_v59, %v170_v1  ;;  %v157_v7 = vmax.f32 %v155_v61, %v156_v3 }
  0x25   :  { %274 = vadd.xlane.f32.xlu0 %v271_v57  ;;  %272 = vadd.xlane.f32.xlu1 %v270_v58 }
  0x26   :  { %v177_v8 = vcombine.low %v164_v0, %v171_v4  ;;  %v176_v9 = vcombine.low %v150_v2, %v157_v7 }
  0x28   :  { %v181_v10 = vsub.f32 %v400_v5, %v177_v8  ;;  %v444_v11 = vsub.f32 %v402_v6, %v176_v9 }
  0x29   :  { %289 = vadd.xlane.f32.xlu0 %v286_v62  ;;  %287 = vadd.xlane.f32.xlu1 %v285_v63 }
  0x2a   :  { %v184_v12 = vmul.f32 1.442695, %v181_v10  ;;  %v182_v13 = vmul.f32 1.442695, %v444_v11  ;;  %v231_v52 = vcombine.high %v181_v10, %v181_v10  ;;  %v230_v55 = vcombine.high %v444_v11, %v444_v11 }
  0x2c   :  { %324 = vpow2.f32 %v184_v12 }
  0x2d   :  { %326 = vpow2.f32 %v182_v13 }
  0x36   :  { %v325_v5 = vpop.eup %324 }
  0x37   :  { %v327_v14 = vpop.eup %326  ;;  %v189_v6 = vcombine.high %v325_v5, %v325_v5  ;;  %v206_v15 = vsel %vm143_vm0, %v325_v5, 0.0 }
  0x38   :  { %v207_v16 = vrot.slane %v206_v15, 4  ;;  %v188_v17 = vcombine.high %v327_v14, %v327_v14  ;;  %v192_v18 = vsel %vm143_vm0, %v327_v14, 0.0 }
  0x39   :  { %v213_v19 = vsel %vm143_vm0, %v189_v6, 0.0  ;;  %v193_v20 = vrot.slane %v192_v18, 4 }
  0x3a   :  { %v208_v21 = vadd.f32 %v207_v16, %v206_v15  ;;  %v214_v22 = vrot.slane %v213_v19, 4  ;;  %v199_v23 = vsel %vm143_vm0, %v188_v17, 0.0 }
  0x3b   :  { %v194_v24 = vadd.f32 %v193_v20, %v192_v18  ;;  %v200_v25 = vrot.slane %v199_v23, 4  ;;  %v260_v18 = vld [vmem:[%s513_s3 + $0x4] sm:$0xf] }
  0x3c   :  { %v209_v26 = vrot.slane %v208_v21, 2  ;;  %v215_v27 = vadd.f32 %v214_v22, %v213_v19  ;;  %v242_v22 = vld [vmem:[%s512_s2] sm:$0xf] }
  0x3d   :  { %v195_v29 = vrot.slane %v194_v24, 2  ;;  %v201_v34 = vadd.f32 %v200_v25, %v199_v23 }
  0x3e   :  { %v210_v35 = vadd.f32 %v209_v26, %v208_v21  ;;  %v216_v36 = vrot.slane %v215_v27, 2  ;;  %v243_v21 = vld [vmem:[%s512_s2 + $0x4] sm:$0xf] }
  0x3f   :  { %v196_v37 = vadd.f32 %v195_v29, %v194_v24  ;;  %v202_v38 = vrot.slane %v201_v34, 2 }
  0x40   :  { %v211_v39 = vrot.slane %v210_v35, 1  ;;  %v217_v40 = vadd.f32 %v216_v36, %v215_v27 }
  0x41   :  { %v197_v41 = vrot.slane %v196_v37, 1  ;;  %v203_v42 = vadd.f32 %v202_v38, %v201_v34 }
  0x42   :  { %v212_v43 = vadd.f32 %v211_v39, %v210_v35  ;;  %v218_v44 = vrot.slane %v217_v40, 1 }
  0x43   :  { %v198_v45 = vadd.f32 %v197_v41, %v196_v37  ;;  %v204_v46 = vrot.slane %v203_v42, 1 }
  0x44   :  { %v219_v47 = vadd.f32 %v218_v44, %v217_v40  ;;  %328 = vlog2.f32 %v212_v43 }
  0x45   :  { %v205_v48 = vadd.f32 %v204_v46, %v203_v42  ;;  %330 = vlog2.f32 %v198_v45 }
  0x46   :  { %332 = vlog2.f32 %v219_v47 }
  0x47   :  { %334 = vlog2.f32 %v205_v48 }
  0x4e   :  { %v329_v49 = vpop.eup %328 }
  0x4f   :  { %v331_v50 = vpop.eup %330  ;;  %v225_v51 = vmul.f32 0.6931472, %v329_v49 }
  0x50   :  { %v333_v53 = vpop.eup %332  ;;  %v221_v54 = vmul.f32 0.6931472, %v331_v50 }
  0x51   :  { %v335_v56 = vpop.eup %334  ;;  %v227_v57 = vmul.f32 0.6931472, %v333_v53  ;;  %v236_v58 = vsub.f32 %v225_v51, %v181_v10 }
  0x52   :  { %v223_v59 = vmul.f32 0.6931472, %v335_v56  ;;  %v234_v60 = vsub.f32 %v221_v54, %v444_v11 }
  0x53   :  { %v237_v61 = vsub.f32 %v227_v57, %v231_v52  ;;  %v240_v62 = vsel %vm422_vm3, %v236_v58, 0.0 }
  0x54   :  { %v249_v63 = vsel %vm143_vm0, %v240_v62, 0.0  ;;  %v235_v0 = vsub.f32 %v223_v59, %v230_v55  ;;  %v238_v1 = vsel %vm414_vm1, %v234_v60, 0.0 }
  0x55   :  { %v241_v2 = vsel %vm426_vm4, %v237_v61, 0.0  ;;  %v244_v3 = vsel %vm143_vm0, %v238_v1, 0.0 }
  0x56   :  { %v250_v4 = vsel %vm143_vm0, %v241_v2, 0.0  ;;  %v239_v7 = vsel %vm418_vm2, %v235_v0, 0.0 }
  0x57   :  { %v251_v8 = vadd.f32 %v250_v4, %v249_v63  ;;  %v245_v32 = vsel %vm143_vm0, %v239_v7, 0.0 }
  0x58   :  { %v246_v9 = vadd.f32 %v245_v32, %v244_v3 }
  0x59   :  { %252 = vadd.xlane.f32.xlu1 %v251_v8 }
  0x5a   :  { %247 = vadd.xlane.f32.xlu0 %v246_v9 }
  0xb2   :  { %v275_v10 = vpop.xlane.xlu0 %274  ;;  %v273_v11 = vpop.xlane.xlu1 %272 }
  0xb3   :  { %v277_v30 = vcvt.f32.s32 %v275_v10  ;;  %v276_v12 = vcvt.f32.s32 %v273_v11 }
  0xb5   :  { %v278_v13 = vshll.u32 %v277_v30, 16 }
  0xb6   :  { %v290_v5 = vpop.xlane.xlu0 %289  ;;  %v288_v14 = vpop.xlane.xlu1 %287 }
  0xb7   :  { %v279_v6 = vadd.s32 %v278_v13, %v276_v12  ;;  %v292_v31 = vcvt.f32.s32 %v290_v5  ;;  %v291_v15 = vcvt.f32.s32 %v288_v14 }
  0xb9   :  { %v295_v16 = vadd.s32 %v279_v6, %v259_v33  ;;  %v293_v17 = vshll.u32 %v292_v31, 16 }
  0xbb   :  { %297 = vst.msk [vmem:[%s513_s3] sm:$0xf] %vm70_vm5, %v295_v16  ;;  %v294_v19 = vadd.s32 %v293_v17, %v291_v15 }
  0xbd   :  { %v296_v20 = vadd.s32 %v294_v19, %v260_v18 }
  0xbf   :  { %298 = vst.msk [vmem:[%s513_s3 + $0x4] sm:$0xf] %vm70_vm5, %v296_v20 }
  0xe6   :  { %v253_v23 = vpop.xlane.xlu1 %252 }
  0xe7   :  { %v255_v24 = vadd.f32 %v253_v23, %v243_v21  ;;  %v248_v25 = vpop.xlane.xlu0 %247 }
  0xe8   :  { %v254_v26 = vadd.f32 %v248_v25, %v242_v22 }
  0xe9   :  { %258 = vst.msk [vmem:[%s512_s2 + $0x4] sm:$0xf] %vm70_vm5, %v255_v24 }
  0xea   :  { %257 = vst.msk [vmem:[%s512_s2] sm:$0xf] %vm70_vm5, %v254_v26 }
  0xeb   :  { %307 = vsyncpa [#allocation3], 1 }

</bundles_post_ra>
